<compile_context>
chip_gen: v7x
topology: tpu7x:2x2x1
jax: 0.10.0
libtpu: 0.0.40
codegen_flags: <defaults>
</compile_context>

<pallas_src>
import functools

import jax
import jax.numpy as jnp
from jax.experimental import pallas as pl
from jax.experimental.pallas import tpu as pltpu


def _round_up(x, m):
    return ((x + m - 1) // m) * m


# ---------------- Fused Pallas kernel ----------------

def _mlp_kernel(x_ref, w1_ref, b1_ref, w2_ref, b2_ref, probas_ref, out_ref,
                *, num_classes):
    # linear1 + ReLU, all f32 (K is tiny, f32 operands cost nothing and keep
    # parity with the f32 PyTorch module).
    h = jnp.dot(x_ref[...], w1_ref[...], preferred_element_type=jnp.float32)
    h = jnp.maximum(h + b1_ref[...], 0.0)
    # linear2: hidden activation stays resident in vregs/VMEM (no HBM trip).
    logits = jnp.dot(h, w2_ref[...], preferred_element_type=jnp.float32)
    logits = logits + b2_ref[...]
    # Only the first num_classes lanes are real; output refs are unpadded
    # (tb, num_classes) so no padded bytes are ever written to HBM.
    lo = logits[:, :num_classes]
    out_ref[...] = lo
    # Exact sigmoid (probas == sigmoid(out); no approx-reciprocal drift).
    probas_ref[...] = 1.0 / (1.0 + jnp.exp(-lo))


# ---------------- Wrapper ----------------

def _choose_batch_tile(B, batch_tile):
    if B <= 8:
        return max(B, 1)                  # one tiny block == full batch
    Bp8 = _round_up(B, 8)
    tb = min(batch_tile, Bp8)
    if tb >= Bp8:
        # Would be a 1-step grid: split so v7x's two TensorCores both run.
        tb = _round_up((Bp8 + 1) // 2, 8)
    return tb


def mlp_forward(x, params, *, batch_tile=4096):
    """Mirrors mlp.forward(x): returns (probas, out)."""
    w1, b1, w2, b2 = params["w1"], params["b1"], params["w2"], params["b2"]
    num_features, hidden = w1.shape
    num_classes = w2.shape[1]

    lead_shape = x.shape[:-1]
    x2 = x.reshape(-1, num_features).astype(jnp.float32)   # x.float()
    B = x2.shape[0]

    # Only the tiny, grid-resident weights/biases are lane-padded to 128.
    # Zero padding is inert: relu(0)=0 and padded w2 columns never reach the
    # (unpadded) output stores.
    HID_PAD = _round_up(max(hidden, 128), 128)
    C_PAD = _round_up(max(num_classes, 128), 128)
    f32 = jnp.float32
    w1p = jnp.zeros((num_features, HID_PAD), f32).at[:, :hidden].set(w1.astype(f32))
    b1p = jnp.zeros((1, HID_PAD), f32).at[:, :hidden].set(
        b1.reshape(1, -1).astype(f32))
    w2p = jnp.zeros((HID_PAD, C_PAD), f32).at[:hidden, :num_classes].set(
        w2.astype(f32))
    b2p = jnp.zeros((1, C_PAD), f32).at[:, :num_classes].set(
        b2.reshape(1, -1).astype(f32))

    tb = _choose_batch_tile(B, batch_tile)
    grid = (pl.cdiv(B, tb),)              # ragged last tile handled by Pallas
    vmem = pltpu.MemorySpace.VMEM

    # Logical (unpadded) flops/bytes for the XLA scheduler.
    cost = pl.CostEstimate(
        flops=2 * B * (num_features * hidden + hidden * num_classes),
        transcendentals=B * num_classes,
        bytes_accessed=(x2.size * 4
                        + (w1.size + b1.size + w2.size + b2.size) * 4
                        + 2 * B * num_classes * 4),
    )

    kernel = functools.partial(_mlp_kernel, num_classes=num_classes)

    probas, out = pl.pallas_call(
        kernel,
        out_shape=(
            jax.ShapeDtypeStruct((B, num_classes), jnp.float32),   # probas
            jax.ShapeDtypeStruct((B, num_classes), jnp.float32),   # out
        ),
        grid=grid,
        in_specs=[
            # x: tiled over batch (double-buffered by the pipeline), f32.
            pl.BlockSpec((tb, num_features), lambda i: (i, 0), memory_space=vmem),
            # Weights / biases: single resident block across all batch tiles.
            pl.BlockSpec((num_features, HID_PAD), lambda i: (0, 0), memory_space=vmem),
            pl.BlockSpec((1, HID_PAD), lambda i: (0, 0), memory_space=vmem),
            pl.BlockSpec((HID_PAD, C_PAD), lambda i: (0, 0), memory_space=vmem),
            pl.BlockSpec((1, C_PAD), lambda i: (0, 0), memory_space=vmem),
        ],
        out_specs=(
            # Unpadded outputs: last dim == full array dim (legal BlockSpec),
            # so no padded bytes hit HBM and no wrapper slice is needed.
            pl.BlockSpec((tb, num_classes), lambda i: (i, 0), memory_space=vmem),
            pl.BlockSpec((tb, num_classes), lambda i: (i, 0), memory_space=vmem),
        ),
        compiler_params=pltpu.CompilerParams(
            dimension_semantics=("parallel",),
            # Safe on v7x's 64 MiB VMEM; per-step buffers here are only a few MiB.
            vmem_limit_bytes=48 * 1024 * 1024,
        ),
        cost_estimate=cost,
    )(x2, w1p, b1p, w2p, b2p)

    out_shape = lead_shape + (num_classes,)
    return probas.reshape(out_shape), out.reshape(out_shape)


# ---------------- Pure-JAX reference (f32) ----------------

def mlp_reference(x, params):
    h = jnp.maximum(x.astype(jnp.float32) @ params["w1"] + params["b1"], 0.0)
    out = h @ params["w2"] + params["b2"]
    return jax.nn.sigmoid(out), out


# ---------------- Demo ----------------

if __name__ == "__main__":
    BATCH = 8
    NUM_FEATURES = 32
    HIDDEN = 4            # fixed by the module: Linear(num_features, 4)
    NUM_CLASSES = 8

    key = jax.random.PRNGKey(0)
    kx, k1, k2, k3, k4 = jax.random.split(key, 5)

    x = jax.random.normal(kx, (BATCH, NUM_FEATURES), dtype=jnp.float32)

    params = {
        "w1": jax.random.normal(k1, (NUM_FEATURES, HIDDEN), dtype=jnp.float32) * 0.1,
        "b1": jax.random.normal(k2, (HIDDEN,), dtype=jnp.float32) * 0.01,
        "w2": jax.random.normal(k3, (HIDDEN, NUM_CLASSES), dtype=jnp.float32) * 0.1,
        "b2": jax.random.normal(k4, (NUM_CLASSES,), dtype=jnp.float32) * 0.01,
    }

    probas, out = jax.jit(mlp_forward)(x, params)
    jax.block_until_ready((probas, out))

    # sanity checks
    assert probas.shape == (BATCH, NUM_CLASSES)
    assert out.shape == (BATCH, NUM_CLASSES)
    assert bool(jnp.all(jnp.isfinite(out)))
    assert bool(jnp.all((probas > 0.0) & (probas <= 1.0)))
    # internal consistency: probas == sigmoid(out) (exact sigmoid in-kernel)
    assert jnp.allclose(probas, jax.nn.sigmoid(out), atol=1e-5)
    # against f32 reference
    ref_p, ref_o = mlp_reference(x, params)
    assert jnp.allclose(out, ref_o, atol=5e-2)
    assert jnp.allclose(probas, ref_p, atol=5e-2)

    print("KERNEL_OK")
</pallas_src>

<mosaic_0001>
module attributes {stable_mosaic.version = 11 : i64} {
  func.func @_mlp_kernel(%arg0: i32, %arg1: memref<8x32xf32, #tpu.memory_space<vmem>>, %arg2: memref<32x128xf32, #tpu.memory_space<vmem>>, %arg3: memref<1x128xf32, #tpu.memory_space<vmem>>, %arg4: memref<128x128xf32, #tpu.memory_space<vmem>>, %arg5: memref<1x128xf32, #tpu.memory_space<vmem>>, %arg6: memref<8x8xf32, #tpu.memory_space<vmem>>, %arg7: memref<8x8xf32, #tpu.memory_space<vmem>>) attributes {dimension_semantics = [#tpu.dimension_semantics<parallel>], iteration_bounds = array<i64: 1>, scalar_prefetch = 0 : i64, scratch_operands = 0 : i64, tpu.core_type = #tpu.core_type<tc>, window_params = [{transform_indices = @transform_0, window_bounds = array<i64: 8, 32>}, {pipeline_mode = #tpu.pipeline_mode<synchronous>, transform_indices = @transform_1, window_bounds = array<i64: 32, 128>}, {pipeline_mode = #tpu.pipeline_mode<synchronous>, transform_indices = @transform_2, window_bounds = array<i64: 1, 128>}, {pipeline_mode = #tpu.pipeline_mode<synchronous>, transform_indices = @transform_3, window_bounds = array<i64: 128, 128>}, {pipeline_mode = #tpu.pipeline_mode<synchronous>, transform_indices = @transform_4, window_bounds = array<i64: 1, 128>}, {transform_indices = @transform_5, window_bounds = array<i64: 8, 8>}, {transform_indices = @transform_6, window_bounds = array<i64: 8, 8>}]} {
    %c0 = arith.constant 0 : index
    %c0_0 = arith.constant 0 : index
    %0 = vector.load %arg1[%c0, %c0_0] : memref<8x32xf32, #tpu.memory_space<vmem>>, vector<8x32xf32>
    %c0_1 = arith.constant 0 : index
    %c0_2 = arith.constant 0 : index
    %1 = vector.load %arg2[%c0_1, %c0_2] : memref<32x128xf32, #tpu.memory_space<vmem>>, vector<32x128xf32>
    %cst = arith.constant dense<0.000000e+00> : vector<8x128xf32>
    %2 = tpu.matmul %0, %1, %cst {dimension_numbers = #tpu.dot_dimension_numbers<[1], [0], [0], [1], [0, 0, 1, 1], [], []>} : vector<8x32xf32>, vector<32x128xf32>, vector<8x128xf32> -> vector<8x128xf32>
    %c0_3 = arith.constant 0 : index
    %c0_4 = arith.constant 0 : index
    %3 = vector.load %arg3[%c0_3, %c0_4] : memref<1x128xf32, #tpu.memory_space<vmem>>, vector<1x128xf32>
    %4 = vector.broadcast %3 : vector<1x128xf32> to vector<8x128xf32>
    %5 = arith.addf %2, %4 : vector<8x128xf32>
    %cst_5 = arith.constant 0.000000e+00 : f32
    %6 = vector.broadcast %cst_5 : f32 to vector<8x128xf32>
    %7 = arith.maximumf %5, %6 : vector<8x128xf32>
    %c0_6 = arith.constant 0 : index
    %c0_7 = arith.constant 0 : index
    %8 = vector.load %arg4[%c0_6, %c0_7] : memref<128x128xf32, #tpu.memory_space<vmem>>, vector<128x128xf32>
    %cst_8 = arith.constant dense<0.000000e+00> : vector<8x128xf32>
    %9 = tpu.matmul %7, %8, %cst_8 {dimension_numbers = #tpu.dot_dimension_numbers<[1], [0], [0], [1], [0, 0, 1, 1], [], []>} : vector<8x128xf32>, vector<128x128xf32>, vector<8x128xf32> -> vector<8x128xf32>
    %c0_9 = arith.constant 0 : index
    %c0_10 = arith.constant 0 : index
    %10 = vector.load %arg5[%c0_9, %c0_10] : memref<1x128xf32, #tpu.memory_space<vmem>>, vector<1x128xf32>
    %11 = vector.broadcast %10 : vector<1x128xf32> to vector<8x128xf32>
    %12 = arith.addf %9, %11 : vector<8x128xf32>
    %13 = vector.extract_strided_slice %12 {offsets = [0, 0], sizes = [8, 8], strides = [1, 1]} : vector<8x128xf32> to vector<8x8xf32>
    %c0_11 = arith.constant 0 : index
    %c0_12 = arith.constant 0 : index
    %14 = vector.load %arg7[%c0_11, %c0_12] : memref<8x8xf32, #tpu.memory_space<vmem>>, vector<8x8xf32>
    tpu.vector_store %arg7[%c0_11, %c0_12], %13 {strides = array<i32>} : memref<8x8xf32, #tpu.memory_space<vmem>>, vector<8x8xf32>,
    %cst_13 = arith.constant 0.000000e+00 : f32
    %15 = vector.broadcast %cst_13 : f32 to vector<8x8xf32>
    %16 = arith.subf %15, %13 : vector<8x8xf32>
    %17 = math.exp %16 : vector<8x8xf32>
    %cst_14 = arith.constant 1.000000e+00 : f32
    %18 = vector.broadcast %cst_14 : f32 to vector<8x8xf32>
    %19 = arith.addf %18, %17 : vector<8x8xf32>
    %cst_15 = arith.constant 1.000000e+00 : f32
    %20 = vector.broadcast %cst_15 : f32 to vector<8x8xf32>
    %21 = arith.divf %20, %19 : vector<8x8xf32>
    %c0_16 = arith.constant 0 : index
    %c0_17 = arith.constant 0 : index
    %22 = vector.load %arg6[%c0_16, %c0_17] : memref<8x8xf32, #tpu.memory_space<vmem>>, vector<8x8xf32>
    tpu.vector_store %arg6[%c0_16, %c0_17], %21 {strides = array<i32>} : memref<8x8xf32, #tpu.memory_space<vmem>>, vector<8x8xf32>,
    return
  }
  func.func @transform_0(%arg0: i32) -> (i32, i32) {
    %c0_i32 = arith.constant 0 : i32
    %c0_i32_0 = arith.constant 0 : i32
    return %arg0, %c0_i32 : i32, i32
  }
  func.func @transform_1(%arg0: i32) -> (i32, i32) {
    %c0_i32 = arith.constant 0 : i32
    %c0_i32_0 = arith.constant 0 : i32
    %c0_i32_1 = arith.constant 0 : i32
    return %c0_i32, %c0_i32_0 : i32, i32
  }
  func.func @transform_2(%arg0: i32) -> (i32, i32) {
    %c0_i32 = arith.constant 0 : i32
    %c0_i32_0 = arith.constant 0 : i32
    %c0_i32_1 = arith.constant 0 : i32
    return %c0_i32, %c0_i32_0 : i32, i32
  }
  func.func @transform_3(%arg0: i32) -> (i32, i32) {
    %c0_i32 = arith.constant 0 : i32
    %c0_i32_0 = arith.constant 0 : i32
    %c0_i32_1 = arith.constant 0 : i32
    return %c0_i32, %c0_i32_0 : i32, i32
  }
  func.func @transform_4(%arg0: i32) -> (i32, i32) {
    %c0_i32 = arith.constant 0 : i32
    %c0_i32_0 = arith.constant 0 : i32
    %c0_i32_1 = arith.constant 0 : i32
    return %c0_i32, %c0_i32_0 : i32, i32
  }
  func.func @transform_5(%arg0: i32) -> (i32, i32) {
    %c0_i32 = arith.constant 0 : i32
    %c0_i32_0 = arith.constant 0 : i32
    return %arg0, %c0_i32 : i32, i32
  }
  func.func @transform_6(%arg0: i32) -> (i32, i32) {
    %c0_i32 = arith.constant 0 : i32
    %c0_i32_0 = arith.constant 0 : i32
    return %arg0, %c0_i32 : i32, i32
  }
}

</mosaic_0001>

<bundles_post_ra>
// kernel: mlp_forward.1
= control target key start
LH: loop header
LB: loop body
LE: loop exit
PB: predicated region body
PF: predicated region fallthrough
CT: control target
= control target key end

     0   :  { %12 = vsyncpa [#allocation3], 0  ;;  %v399_v3 = vmov 0.0|0.0   ;;  %vm400_vm0 = vmmov 0   ;;  %v401_v6 = vmov 0.0   ;;  %s534_s0 = inlined_call_operand.vmem [shape: f32[8,32], index: 0, kind: input, shape index: {}]   ;;  %s535_s1 = inlined_call_operand.vmem [shape: f32[32,128], index: 1, kind: input, shape index: {}]   ;;  %s536_s2 = inlined_call_operand.vmem [shape: f32[1,128], index: 2, kind: input, shape index: {}]   ;;  %s537_s3 = inlined_call_operand.vmem [shape: f32[128,128], index: 3, kind: input, shape index: {}]   ;;  %s538_s4 = inlined_call_operand.vmem [shape: f32[1,128], index: 4, kind: input, shape index: {}]   ;;  %s539_s5 = inlined_call_operand.hbm [shape: f32[8,8], index: 5, kind: output, shape index: {0}]   ;;  %s540_s6 = inlined_call_operand.hbm [shape: f32[8,8], index: 6, kind: output, shape index: {1}]  }
   0x1   :  { %v25_v0 = vld [vmem:[%s535_s1] sm:$0xff]  ;;  %v26_v1 = vld [vmem:[%s535_s1 + $0x8] sm:$0xff]  ;;  %v27_v2 = vld [vmem:[%s535_s1 + $0x10] sm:$0xff]  ;;  %312 = vmatprep.subr.bf16.mxu0 %v399_v3  ;;  %274 = vmatprep.mubr.msk.f32.mxu0 %vm400_vm0, %v401_v6 }
   0x2   :  { %v313_v4 = vpack.c.bf16 %v26_v1, %v25_v0  ;;  %v28_v5 = vld [vmem:[%s535_s1 + $0x18] sm:$0xff]  ;;  %v111_v7 = vld [vmem:[%s537_s3] sm:$0xff]  ;;  %318 = vmatprep.subr.bf16.mxu1 %v399_v3  ;;  %v112_v8 = vld [vmem:[%s537_s3 + $0x8] sm:$0xff]  ;;  %309 = vmatprep.mubr.msk.f32.mxu1 %vm400_vm0, %v401_v6 }
   0x3   :  { %v113_v9 = vld [vmem:[%s537_s3 + $0x10] sm:$0xff]  ;;  %v114_v10 = vld [vmem:[%s537_s3 + $0x18] sm:$0xff]  ;;  %v316_v11 = vpack.c.bf16 %v28_v5, %v27_v2  ;;  %v319_v12 = vpack.c.bf16 %v112_v8, %v111_v7  ;;  %v115_v14 = vld [vmem:[%s537_s3 + $0x20] sm:$0xff] }
   0x4   :  { %314 = vmatpush3.bf16.msra.mxu0 %v313_v4  ;;  %v322_v13 = vpack.c.bf16 %v114_v10, %v113_v9  ;;  %v116_v15 = vld [vmem:[%s537_s3 + $0x28] sm:$0xff] }
   0x5   :  { %315 = vmatprep.subr.bf16.mxu0 %v399_v3  ;;  %320 = vmatpush3.bf16.msra.mxu1 %v319_v12 }
   0x6   :  { %321 = vmatprep.subr.bf16.mxu1 %v399_v3 }
   0x7   :  { %13 = vsyncpa [#allocation5], 0  ;;  %v24_v16 = vld [vmem:[%s534_s0] sm:$0xff]  ;;  %vm36_vm1 = vcmask 261120   ;;  %v325_v17 = vpack.c.bf16 %v116_v15, %v115_v14  ;;  %v117_v18 = vld [vmem:[%s537_s3 + $0x30] sm:$0xff]  ;;  %s402_s16 = smov [#allocation4]  }
   0x8   :  { %317 = vmatpush3.bf16.msra.mxu0 %v316_v11  ;;  %v118_v19 = vld [vmem:[%s537_s3 + $0x38] sm:$0xff]  ;;  %v119_v21 = vld [vmem:[%s537_s3 + $0x40] sm:$0xff]  ;;  %v120_v22 = vld [vmem:[%s537_s3 + $0x48] sm:$0xff]  ;;  %s229_s17 = sshll.u32 %s402_s16, 4  ;;  %vm204_vm2 = vcmask 64512   ;;  %s230_s17 = int_to_ptr.vmem [resolvable:$true] %s229_s17 }
   0x9   :  { %323 = vmatpush3.bf16.msra.mxu1 %v322_v13  ;;  %v328_v20 = vpack.c.bf16 %v118_v19, %v117_v18  ;;  %v331_v23 = vpack.c.bf16 %v120_v22, %v119_v21  ;;  %v121_v24 = vld [vmem:[%s537_s3 + $0x50] sm:$0xff]  ;;  %v122_v25 = vld [vmem:[%s537_s3 + $0x58] sm:$0xff]  ;;  %v123_v27 = vld [vmem:[%s537_s3 + $0x60] sm:$0xff]  ;;  %p356_p1 = scmp.lt.s32.totalorder %s230_s17, %s230_s17 }
   0xa   :  { %324 = vmatprep.subr.bf16.mxu1 %v399_v3  ;;  %v334_v26 = vpack.c.bf16 %v122_v25, %v121_v24  ;;  %v124_v28 = vld [vmem:[%s537_s3 + $0x68] sm:$0xff]  ;;  %v125_v30 = vld [vmem:[%s537_s3 + $0x70] sm:$0xff]  ;;  %v126_v31 = vld [vmem:[%s537_s3 + $0x78] sm:$0xff] }
   0xb   :  { %275 = vmatmul.mubr.msk.f32.vlgmr.msra.gmra.mrb[0].mxu0 %vm36_vm1, %v24_v16  ;;  %v337_v29 = vpack.c.bf16 %v124_v28, %v123_v27  ;;  %v340_v32 = vpack.c.bf16 %v126_v31, %v125_v30  ;;  %v241_v33 = vld [vmem:[%s536_s2] ss:$0 sm:$0xff]  ;;  %s351_s2 = scalar_lea.vmem %s230_s17, 128 }
   0xc   :  { %v243_v38 = vld [vmem:[%s538_s4] ss:$0 sm:$0xff]  ;;  %p352_p0 = scmp.ne.s32.totalorder %s230_s17, %s351_s2  ;;  %p357_p2 = scmp.lt.s32.totalorder %s351_s2, %s351_s2 }
   0xd   :  { %326 = vmatpush3.bf16.msra.mxu1 %v325_v17 }
   0xe   :  { %327 = vmatprep.subr.bf16.mxu1 %v399_v3  ;;  %p358_p3 = por %p357_p2, %p356_p1 }
  0x10   :  { %p359_p4 = pnand %p358_p3, %p352_p0 }
  0x11   :  { %329 = vmatpush3.bf16.msra.mxu1 %v328_v20 }
  0x12   :  { %330 = vmatprep.subr.bf16.mxu1 %v399_v3 }
  0x15   :  { %332 = vmatpush3.bf16.msra.mxu1 %v331_v23 }
  0x16   :  { %333 = vmatprep.subr.bf16.mxu1 %v399_v3 }
  0x19   :  { %335 = vmatpush3.bf16.msra.mxu1 %v334_v26 }
  0x1a   :  { %336 = vmatprep.subr.bf16.mxu1 %v399_v3 }
  0x1d   :  { %338 = vmatpush3.bf16.msra.mxu1 %v337_v29 }
  0x1e   :  { %339 = vmatprep.subr.bf16.mxu1 %v399_v3 }
  0x21   :  { %341 = vmatpush3.bf16.msra.mxu1 %v340_v32 }
  0xde   :  { %v106_v34 = vpop.f32.mrb[0].mxu0 }
  0xdf   :  { %v107_v35 = vadd.f32 %v241_v33, %v106_v34  ;;  %v276_v36 = vpop.f32.mrb[1].mxu0 }
  0xe1   :  { %v110_v37 = vmax.f32 %v107_v35, 0.0 }
  0xe3   :  { %310 = vmatmul.mubr.f32.vlgmr.msra.gmra.mrb[0].mxu1 %v110_v37 }
 0x1b6   :  { %v200_v39 = vpop.f32.mrb[0].mxu1 }
 0x1b7   :  { %v201_v40 = vadd.f32 %v243_v38, %v200_v39  ;;  %v311_v41 = vpop.f32.mrb[1].mxu1 }
 0x1b9   :  { %v206_v42 = vsub.f32 0.0, %v201_v40  ;;  %205 = vst.msk [vmem:[#allocation4] sm:$0xff] %vm204_vm2, %v201_v40 }
 0x1ba   :  { %362 = shalt.err (!%p359_p4)
}
 0x1bb   :  { %s363_s4 = scalar_lea.hbm %s540_s6, 128 }
 0x1bc   :  { %p364_p5 = scmp.ne.s32.totalorder %s540_s6, %s363_s4  ;;  %p367_p6 = scmp.lt.u32.totalorder %s363_s4, %s540_s6 }
 0x1be   :  { %p369_p7 = pnand %p367_p6, %p364_p5 }
 0x1c0   :  { %372 = shalt.err (!%p369_p7)
}
 0x1c1   :  { %232 = dma.vmem_to_hbm [thread:$0]  %s230_s17, 128, %s540_s6, [#allocation5]   ;;  %v207_v43 = vmul.f32 1.442695, %v206_v42 }
 0x1c2   :  { %s403_s24 = smov [#allocation2]  }
 0x1c3   :  { %347 = vpow2.f32 %v207_v43  ;;  %s219_s25 = sshll.u32 %s403_s24, 4  ;;  %s220_s25 = int_to_ptr.vmem [resolvable:$true] %s219_s25 }
 0x1c4   :  { %s373_s26 = scalar_lea.vmem %s220_s25, 128  ;;  %p378_p9 = scmp.lt.s32.totalorder %s220_s25, %s220_s25 }
 0x1c5   :  { %p374_p8 = scmp.ne.s32.totalorder %s220_s25, %s373_s26  ;;  %p379_p10 = scmp.lt.s32.totalorder %s373_s26, %s373_s26 }
 0x1c7   :  { %p380_p11 = por %p379_p10, %p378_p9 }
 0x1c9   :  { %p381_p12 = pnand %p380_p11, %p374_p8 }
 0x1cd   :  { %v348_v44 = vpop.eup %347 }
 0x1ce   :  { %v209_v45 = vadd.f32 1.0, %v348_v44 }
 0x1d0   :  { %349 = vrcp.f32 %v209_v45 }
 0x1da   :  { %v350_v46 = vpop.eup %349 }
 0x1db   :  { %212 = vst.msk [vmem:[#allocation2] sm:$0xff] %vm204_vm2, %v350_v46 }
 0x1dc   :  { %384 = shalt.err (!%p381_p12)
}
 0x1dd   :  { %s385_s28 = scalar_lea.hbm %s539_s5, 128 }
 0x1de   :  { %p386_p13 = scmp.ne.s32.totalorder %s539_s5, %s385_s28  ;;  %p389_p0 = scmp.lt.u32.totalorder %s385_s28, %s539_s5 }
 0x1e0   :  { %p391_p1 = pnand %p389_p0, %p386_p13 }
 0x1e2   :  { %394 = shalt.err (!%p391_p1)
}
 0x1e3   :  { %222 = dma.vmem_to_hbm [thread:$0]  %s220_s25, 128, %s539_s5, [#allocation3]  }
 0x1e4   :  { %395 = dma.done.wait [#allocation3], 128  }
 0x1e5   :  { %396 = vsyncadd [#allocation3], 4294967168 }
 0x1e6   :  { %397 = dma.done.wait [#allocation5], 128  }
 0x1e7   :  { %398 = vsyncadd [#allocation5], 4294967168 }
 0x1e8   :  { %239 = vsyncpa [#allocation3], 1 }
 0x1e9   :  { %240 = vsyncpa [#allocation5], 1 }

</bundles_post_ra>
